<compile_context>
chip_gen: v7x
topology: tpu7x:2x2x1
jax: 0.10.0
libtpu: 0.0.40
codegen_flags: <defaults>
</compile_context>

<pallas_src>
import functools

import jax
import jax.numpy as jnp
from jax.experimental import pallas as pl
from jax.experimental.pallas import tpu as pltpu

LANE = 128
BF16_SUBLANE = 16  # bf16 min tile is (16, 128); round batch tiles to 16 rows


def _round_up(x, m):
    return ((x + m - 1) // m) * m


def _make_qnet_kernel(n_layers, state_size, action_size):
    """Build the MLP kernel for a network of `n_layers` linear layers."""

    def kernel(x_ref, w_ref, b_ref, out_ref):
        # x_ref  : (TB, S)    f32   -- batch tile of raw states (pipelined)
        # w_ref  : (L, F, F)  bf16  -- packed, lane-padded weights (resident)
        # b_ref  : (L, 1, F)  f32   -- packed, lane-padded biases  (resident)
        # out_ref: (TB, A)    f32   -- only the real action lanes are written
        x = x_ref[...].astype(jnp.bfloat16)                       # (TB, S)
        # First layer: contract over the *real* K = state_size; Mosaic pads
        # the small K dimension internally in VMEM.
        h = jnp.dot(x, w_ref[0, :state_size, :],
                    preferred_element_type=jnp.float32) + b_ref[0]
        for layer in range(1, n_layers):
            h = jnp.maximum(h, 0.0).astype(jnp.bfloat16)          # ReLU, back to bf16
            h = jnp.dot(h, w_ref[layer],
                        preferred_element_type=jnp.float32) + b_ref[layer]
        # Store only the real action lanes (narrow last dim == full array dim).
        out_ref[...] = h[:, :action_size]

    return kernel


@functools.partial(jax.jit, static_argnames=("action_size",))
def qnetwork_forward(state, params, *, action_size):
    """state: [B, state_size] f32.  params: {'w': (L,F,F) bf16, 'b': (L,1,F) f32}."""
    w = params["w"]
    b = params["b"]
    n_layers, feat, _ = w.shape
    batch, state_size = state.shape

    # Pad the batch only to the bf16 sublane granule (16) -- a tiny pad on the
    # narrow (B, state_size) input, not the old full 128-lane slab.
    b_pad = _round_up(batch, BF16_SUBLANE)
    x = state if b_pad == batch else jnp.pad(state, ((0, b_pad - batch), (0, 0)))

    # Batch tile:
    #   * small batches (<=256 rows): one tile, rounded to 16 sublanes.
    #   * larger batches: at least 2 grid steps (both TCs on v7x), capped at
    #     512 rows per tile (amortizes per-step overhead, ~85% of HBM roofline
    #     per the measured tiling table). Ragged last tile handled by Pallas
    #     masked edge-block writes.
    if b_pad <= 256:
        tb = b_pad
    else:
        tb = min(512, _round_up(pl.cdiv(b_pad, 2), BF16_SUBLANE))
    grid = (pl.cdiv(b_pad, tb),)

    flops = 2 * b_pad * (state_size * feat + (n_layers - 1) * feat * feat)
    bytes_accessed = (x.size * 4          # f32 states in (natural width)
                      + w.size * 2        # bf16 weight slab
                      + b.size * 4        # f32 bias slab
                      + b_pad * action_size * 4)  # narrow f32 output

    kernel = _make_qnet_kernel(n_layers, state_size, action_size)

    out_padded = pl.pallas_call(
        kernel,
        out_shape=jax.ShapeDtypeStruct((b_pad, action_size), jnp.float32),
        grid=grid,
        in_specs=[
            # state tile at natural width (last dim == full array dim).
            pl.BlockSpec((tb, state_size), lambda i: (i, 0)),
            # packed weights / biases: constant index_map -> resident in VMEM.
            pl.BlockSpec((n_layers, feat, feat), lambda i: (0, 0, 0)),
            pl.BlockSpec((n_layers, 1, feat), lambda i: (0, 0, 0)),
        ],
        # Narrow output: only the real action lanes ever touch HBM.
        out_specs=pl.BlockSpec((tb, action_size), lambda i: (i, 0)),
        compiler_params=pltpu.CompilerParams(
            dimension_semantics=("parallel",),
            vmem_limit_bytes=32 * 1024 * 1024),
        cost_estimate=pl.CostEstimate(
            flops=flops, transcendentals=0, bytes_accessed=bytes_accessed),
    )(x, w, b)

    return out_padded[:batch, :]


def init_params(key, state_size, action_size, hidden_layers):
    """nn.Linear-style init U(-1/sqrt(fan_in), +), packed + lane-padded.

    Weights are stored pre-transposed as [in, out] (so x @ W + b matches
    PyTorch's x @ W.T + b), zero-padded to F=128 lanes, stacked into a single
    (L, F, F) bf16 slab; biases go into an (L, 1, F) f32 slab.  Zero padding
    keeps padded activation lanes exactly 0 through every layer.
    """
    sizes = [state_size] + list(hidden_layers) + [action_size]
    feat = _round_up(max(sizes), LANE)
    n_layers = len(sizes) - 1
    w_slab = jnp.zeros((n_layers, feat, feat), jnp.float32)
    b_slab = jnp.zeros((n_layers, 1, feat), jnp.float32)
    for l, (fan_in, fan_out) in enumerate(zip(sizes[:-1], sizes[1:])):
        key, kw, kb = jax.random.split(key, 3)
        bound = 1.0 / (fan_in ** 0.5)
        wl = jax.random.uniform(kw, (fan_in, fan_out), jnp.float32, -bound, bound)
        bl = jax.random.uniform(kb, (fan_out,), jnp.float32, -bound, bound)
        w_slab = w_slab.at[l, :fan_in, :fan_out].set(wl)
        b_slab = b_slab.at[l, 0, :fan_out].set(bl)
    return {"w": w_slab.astype(jnp.bfloat16), "b": b_slab}


def _reference_forward(state, params, action_size):
    """Pure-JAX reference with the same bf16 quantization points as the kernel."""
    w = params["w"].astype(jnp.float32)     # bf16-quantized values, exact in f32
    b = params["b"]
    n_layers, feat, _ = w.shape
    batch, state_size = state.shape
    hi = jax.lax.Precision.HIGHEST
    h = state.astype(jnp.bfloat16).astype(jnp.float32)
    h = jnp.dot(h, w[0, :state_size, :], precision=hi) + b[0]
    for l in range(1, n_layers):
        h = jnp.maximum(h, 0.0)
        h = h.astype(jnp.bfloat16).astype(jnp.float32)
        h = jnp.dot(h, w[l], precision=hi) + b[l]
    return h[:, :action_size]


if __name__ == "__main__":
    key = jax.random.PRNGKey(0)
    k_params, k_state1, k_state2 = jax.random.split(key, 3)

    state_size = 8
    action_size = 4
    hidden_layers = [64, 64, 32]

    params = init_params(k_params, state_size, action_size, hidden_layers)

    # Small batch: b_pad=16, single grid step, single (16, 8) input tile.
    state_small = jax.random.normal(k_state1, (8, state_size), dtype=jnp.float32)
    out_small = jax.block_until_ready(
        qnetwork_forward(state_small, params, action_size=action_size))
    ref_small = _reference_forward(state_small, params, action_size)
    assert out_small.shape == (8, action_size)
    assert jnp.allclose(out_small, ref_small, atol=1e-3, rtol=1e-3)

    # Ragged batch > 256: b_pad=304, tb=160, grid=(2,) with a masked edge tile
    # (exercises the >=2 parallel steps path and the ragged-edge handling).
    state_big = jax.random.normal(k_state2, (300, state_size), dtype=jnp.float32)
    out_big = jax.block_until_ready(
        qnetwork_forward(state_big, params, action_size=action_size))
    ref_big = _reference_forward(state_big, params, action_size)
    assert out_big.shape == (300, action_size)
    assert jnp.allclose(out_big, ref_big, atol=1e-3, rtol=1e-3)

    print("KERNEL_OK")
</pallas_src>

<mosaic_0001>
module attributes {stable_mosaic.version = 11 : i64} {
  func.func @kernel(%arg0: i32, %arg1: memref<16x8xf32, #tpu.memory_space<vmem>>, %arg2: memref<4x128x128xbf16, #tpu.memory_space<vmem>>, %arg3: memref<4x1x128xf32, #tpu.memory_space<vmem>>, %arg4: memref<16x4xf32, #tpu.memory_space<vmem>>) attributes {dimension_semantics = [#tpu.dimension_semantics<parallel>], iteration_bounds = array<i64: 1>, scalar_prefetch = 0 : i64, scratch_operands = 0 : i64, tpu.core_type = #tpu.core_type<tc>, window_params = [{transform_indices = @transform_0, window_bounds = array<i64: 16, 8>}, {pipeline_mode = #tpu.pipeline_mode<synchronous>, transform_indices = @transform_1, window_bounds = array<i64: 4, 128, 128>}, {pipeline_mode = #tpu.pipeline_mode<synchronous>, transform_indices = @transform_2, window_bounds = array<i64: 4, 1, 128>}, {transform_indices = @transform_3, window_bounds = array<i64: 16, 4>}]} {
    %c0 = arith.constant 0 : index
    %c0_0 = arith.constant 0 : index
    %0 = vector.load %arg1[%c0, %c0_0] : memref<16x8xf32, #tpu.memory_space<vmem>>, vector<16x8xf32>
    %1 = arith.truncf %0 : vector<16x8xf32> to vector<16x8xbf16>
    %c0_1 = arith.constant 0 : index
    %c0_2 = arith.constant 0 : index
    %c0_3 = arith.constant 0 : index
    %2 = vector.load %arg2[%c0_1, %c0_2, %c0_3] : memref<4x128x128xbf16, #tpu.memory_space<vmem>>, vector<1x8x128xbf16>
    %3 = vector.shape_cast %2 : vector<1x8x128xbf16> to vector<8x128xbf16>
    %cst = arith.constant dense<0.000000e+00> : vector<16x128xf32>
    %4 = tpu.matmul %1, %3, %cst {dimension_numbers = #tpu.dot_dimension_numbers<[1], [0], [0], [1], [0, 0, 1, 1], [], []>} : vector<16x8xbf16>, vector<8x128xbf16>, vector<16x128xf32> -> vector<16x128xf32>
    %c0_4 = arith.constant 0 : index
    %c0_5 = arith.constant 0 : index
    %c0_6 = arith.constant 0 : index
    %5 = vector.load %arg3[%c0_4, %c0_5, %c0_6] : memref<4x1x128xf32, #tpu.memory_space<vmem>>, vector<1x1x128xf32>
    %6 = vector.shape_cast %5 : vector<1x1x128xf32> to vector<1x128xf32>
    %7 = vector.broadcast %6 : vector<1x128xf32> to vector<16x128xf32>
    %8 = arith.addf %4, %7 : vector<16x128xf32>
    %cst_7 = arith.constant 0.000000e+00 : f32
    %9 = vector.broadcast %cst_7 : f32 to vector<16x128xf32>
    %10 = arith.maximumf %8, %9 : vector<16x128xf32>
    %11 = arith.truncf %10 : vector<16x128xf32> to vector<16x128xbf16>
    %c1 = arith.constant 1 : index
    %c0_8 = arith.constant 0 : index
    %c0_9 = arith.constant 0 : index
    %12 = vector.load %arg2[%c1, %c0_8, %c0_9] : memref<4x128x128xbf16, #tpu.memory_space<vmem>>, vector<1x128x128xbf16>
    %13 = vector.shape_cast %12 : vector<1x128x128xbf16> to vector<128x128xbf16>
    %cst_10 = arith.constant dense<0.000000e+00> : vector<16x128xf32>
    %14 = tpu.matmul %11, %13, %cst_10 {dimension_numbers = #tpu.dot_dimension_numbers<[1], [0], [0], [1], [0, 0, 1, 1], [], []>} : vector<16x128xbf16>, vector<128x128xbf16>, vector<16x128xf32> -> vector<16x128xf32>
    %c1_11 = arith.constant 1 : index
    %c0_12 = arith.constant 0 : index
    %c0_13 = arith.constant 0 : index
    %15 = vector.load %arg3[%c1_11, %c0_12, %c0_13] : memref<4x1x128xf32, #tpu.memory_space<vmem>>, vector<1x1x128xf32>
    %16 = vector.shape_cast %15 : vector<1x1x128xf32> to vector<1x128xf32>
    %17 = vector.broadcast %16 : vector<1x128xf32> to vector<16x128xf32>
    %18 = arith.addf %14, %17 : vector<16x128xf32>
    %cst_14 = arith.constant 0.000000e+00 : f32
    %19 = vector.broadcast %cst_14 : f32 to vector<16x128xf32>
    %20 = arith.maximumf %18, %19 : vector<16x128xf32>
    %21 = arith.truncf %20 : vector<16x128xf32> to vector<16x128xbf16>
    %c2 = arith.constant 2 : index
    %c0_15 = arith.constant 0 : index
    %c0_16 = arith.constant 0 : index
    %22 = vector.load %arg2[%c2, %c0_15, %c0_16] : memref<4x128x128xbf16, #tpu.memory_space<vmem>>, vector<1x128x128xbf16>
    %23 = vector.shape_cast %22 : vector<1x128x128xbf16> to vector<128x128xbf16>
    %cst_17 = arith.constant dense<0.000000e+00> : vector<16x128xf32>
    %24 = tpu.matmul %21, %23, %cst_17 {dimension_numbers = #tpu.dot_dimension_numbers<[1], [0], [0], [1], [0, 0, 1, 1], [], []>} : vector<16x128xbf16>, vector<128x128xbf16>, vector<16x128xf32> -> vector<16x128xf32>
    %c2_18 = arith.constant 2 : index
    %c0_19 = arith.constant 0 : index
    %c0_20 = arith.constant 0 : index
    %25 = vector.load %arg3[%c2_18, %c0_19, %c0_20] : memref<4x1x128xf32, #tpu.memory_space<vmem>>, vector<1x1x128xf32>
    %26 = vector.shape_cast %25 : vector<1x1x128xf32> to vector<1x128xf32>
    %27 = vector.broadcast %26 : vector<1x128xf32> to vector<16x128xf32>
    %28 = arith.addf %24, %27 : vector<16x128xf32>
    %cst_21 = arith.constant 0.000000e+00 : f32
    %29 = vector.broadcast %cst_21 : f32 to vector<16x128xf32>
    %30 = arith.maximumf %28, %29 : vector<16x128xf32>
    %31 = arith.truncf %30 : vector<16x128xf32> to vector<16x128xbf16>
    %c3 = arith.constant 3 : index
    %c0_22 = arith.constant 0 : index
    %c0_23 = arith.constant 0 : index
    %32 = vector.load %arg2[%c3, %c0_22, %c0_23] : memref<4x128x128xbf16, #tpu.memory_space<vmem>>, vector<1x128x128xbf16>
    %33 = vector.shape_cast %32 : vector<1x128x128xbf16> to vector<128x128xbf16>
    %cst_24 = arith.constant dense<0.000000e+00> : vector<16x128xf32>
    %34 = tpu.matmul %31, %33, %cst_24 {dimension_numbers = #tpu.dot_dimension_numbers<[1], [0], [0], [1], [0, 0, 1, 1], [], []>} : vector<16x128xbf16>, vector<128x128xbf16>, vector<16x128xf32> -> vector<16x128xf32>
    %c3_25 = arith.constant 3 : index
    %c0_26 = arith.constant 0 : index
    %c0_27 = arith.constant 0 : index
    %35 = vector.load %arg3[%c3_25, %c0_26, %c0_27] : memref<4x1x128xf32, #tpu.memory_space<vmem>>, vector<1x1x128xf32>
    %36 = vector.shape_cast %35 : vector<1x1x128xf32> to vector<1x128xf32>
    %37 = vector.broadcast %36 : vector<1x128xf32> to vector<16x128xf32>
    %38 = arith.addf %34, %37 : vector<16x128xf32>
    %39 = vector.extract_strided_slice %38 {offsets = [0, 0], sizes = [16, 4], strides = [1, 1]} : vector<16x128xf32> to vector<16x4xf32>
    %c0_28 = arith.constant 0 : index
    %c0_29 = arith.constant 0 : index
    %40 = vector.load %arg4[%c0_28, %c0_29] : memref<16x4xf32, #tpu.memory_space<vmem>>, vector<16x4xf32>
    tpu.vector_store %arg4[%c0_28, %c0_29], %39 {strides = array<i32>} : memref<16x4xf32, #tpu.memory_space<vmem>>, vector<16x4xf32>,
    return
  }
  func.func @transform_0(%arg0: i32) -> (i32, i32) {
    %c0_i32 = arith.constant 0 : i32
    %c0_i32_0 = arith.constant 0 : i32
    return %arg0, %c0_i32 : i32, i32
  }
  func.func @transform_1(%arg0: i32) -> (i32, i32, i32) {
    %c0_i32 = arith.constant 0 : i32
    %c0_i32_0 = arith.constant 0 : i32
    %c0_i32_1 = arith.constant 0 : i32
    %c0_i32_2 = arith.constant 0 : i32
    return %c0_i32, %c0_i32_0, %c0_i32_1 : i32, i32, i32
  }
  func.func @transform_2(%arg0: i32) -> (i32, i32, i32) {
    %c0_i32 = arith.constant 0 : i32
    %c0_i32_0 = arith.constant 0 : i32
    %c0_i32_1 = arith.constant 0 : i32
    %c0_i32_2 = arith.constant 0 : i32
    return %c0_i32, %c0_i32_0, %c0_i32_1 : i32, i32, i32
  }
  func.func @transform_3(%arg0: i32) -> (i32, i32) {
    %c0_i32 = arith.constant 0 : i32
    %c0_i32_0 = arith.constant 0 : i32
    return %arg0, %c0_i32 : i32, i32
  }
}

</mosaic_0001>

<bundles_post_ra>
// kernel: qnetwork_forward.1
= control target key start
LH: loop header
LB: loop body
LE: loop exit
PB: predicated region body
PF: predicated region fallthrough
CT: control target
= control target key end

     0   :  { %8 = vsyncpa [#allocation3], 0  ;;  %s628_s12 = smov [#allocation2]   ;;  %s722_s0 = inlined_call_operand.vmem [shape: f32[16,8], index: 0, kind: input, shape index: {}]   ;;  %s723_s1 = inlined_call_operand.hbm [shape: bf16[4,128,128], index: 1, kind: input, shape index: {}]   ;;  %s724_s2 = inlined_call_operand.vmem [shape: f32[4,1,128], index: 2, kind: input, shape index: {}]   ;;  %s725_s3 = inlined_call_operand.vmem [shape: f32[16,4], index: 3, kind: output, shape index: {}]  }
   0x1   :  { %s16_s13 = sshll.u32 %s628_s12, 4  ;;  %s604_s16 = scalar_lea.hbm %s723_s1, 4096  ;;  %s17_s13 = int_to_ptr.vmem [resolvable:$true] %s16_s13 }
   0x2   :  { %p605_p0 = scmp.ne.s32.totalorder %s723_s1, %s604_s16  ;;  %p608_p1 = scmp.lt.u32.totalorder %s604_s16, %s723_s1 }
   0x4   :  { %p610_p2 = pnand %p608_p1, %p605_p0 }
   0x6   :  { %613 = shalt.err (!%p610_p2)
}
   0x7   :  { %s614_s21 = scalar_lea.vmem %s17_s13, 4096  ;;  %p619_p4 = scmp.lt.s32.totalorder %s17_s13, %s17_s13 }
   0x8   :  { %p615_p3 = scmp.ne.s32.totalorder %s17_s13, %s614_s21  ;;  %p620_p5 = scmp.lt.s32.totalorder %s614_s21, %s614_s21 }
   0xa   :  { %p621_p6 = por %p620_p5, %p619_p4 }
   0xc   :  { %p622_p7 = pnand %p621_p6, %p615_p3 }
   0xe   :  { %625 = shalt.err (!%p622_p7)
}
   0xf   :  { %s629_s22 = smov 64   ;;  %s630_s23 = smov 4  }
  0x10   :  { %22 = dma.hbm_to_vmem [thread:$0]  %s723_s1, 4096, %s17_s13, [#allocation3], %s629_s22, %s629_s22, %s630_s23  }
  0x11   :  { %626 = dma.done.wait [#allocation3], 4096  }
  0x12   :  { %627 = vsyncadd [#allocation3], 4294963200  ;;  %v631_v0 = vmov 0.0   ;;  %vm632_vm0 = vmmov 0   ;;  %vm44_vm1 = vcmask 1043456   ;;  %v29_v2 = vld [vmem:[%s722_s0] sm:$0xff] }
  0x13   :  { %509 = vmatprep.subr.bf16.mxu0 %v631_v0  ;;  %511 = vmatprep.mubr.msk.bf16.mxu0 %vm632_vm0, %v631_v0  ;;  %v32_v1 = vld [vmem:[#allocation2] sm:$0xf]  ;;  %v30_v3 = vld [vmem:[%s722_s0 + $0x8] sm:$0xff]  ;;  %vm40_vm2 = vcmask 64512   ;;  %v582_v8 = vld [vmem:[#allocation2 + $0x50] sm:$0xff]   ;;  %vm440_vm3 = vcmask 31744  }
  0x14   :  { %515 = vmatprep.subr.bf16.mxu1 %v631_v0  ;;  %531 = vmatprep.mubr.msk.bf16.mxu1 %vm632_vm0, %v631_v0  ;;  %v46_v4 = vsel %vm44_vm1, %v32_v1, 0  ;;  %v31_v5 = vpack.c.bf16 %v30_v3, %v29_v2  ;;  %v580_v6 = vld [vmem:[#allocation2 + $0x40] sm:$0xff]   ;;  %v581_v7 = vld [vmem:[#allocation2 + $0x48] sm:$0xff]   ;;  %v583_v9 = vld [vmem:[#allocation2 + $0x58] sm:$0xff]  }
  0x15   :  { %510 = vmatpush3.bf16.msra.mxu0 %v46_v4  ;;  %516 = vmatpush3.bf16.msra.mxu1 %v580_v6  ;;  %v584_v10 = vld [vmem:[#allocation2 + $0x60] sm:$0xff]   ;;  %v585_v11 = vld [vmem:[#allocation2 + $0x68] sm:$0xff]   ;;  %v586_v12 = vld [vmem:[#allocation2 + $0x70] sm:$0xff]  }
  0x16   :  { %535 = vmatprep.subr.bf16.mxu0 %v631_v0  ;;  %517 = vmatprep.subr.bf16.mxu1 %v631_v0  ;;  %v587_v13 = vld [vmem:[#allocation2 + $0x78] sm:$0xff]   ;;  %v588_v14 = vld [vmem:[#allocation2 + $0x80] sm:$0xff]   ;;  %v589_v15 = vld [vmem:[#allocation2 + $0x88] sm:$0xff]  }
  0x17   :  { %v590_v16 = vld [vmem:[#allocation2 + $0x90] sm:$0xff]   ;;  %v591_v17 = vld [vmem:[#allocation2 + $0x98] sm:$0xff]   ;;  %v592_v18 = vld [vmem:[#allocation2 + $0xa0] sm:$0xff]  }
  0x18   :  { %512 = vmatmul.mubr.msk.bf16.vlgmr.msra.gmra.mrb[0].mxu0 %vm40_vm2, %v31_v5  ;;  %v593_v19 = vld [vmem:[#allocation2 + $0xa8] sm:$0xff]   ;;  %v448_v20 = vld [vmem:[%s724_s2] ss:$0 sm:$0xff]  ;;  %v594_v30 = vld [vmem:[#allocation2 + $0xb0] sm:$0xff]  }
  0x19   :  { %551 = vmatprep.mubr.msk.bf16.mxu0 %vm632_vm0, %v631_v0  ;;  %518 = vmatpush3.bf16.msra.mxu1 %v581_v7  ;;  %v595_v31 = vld [vmem:[#allocation2 + $0xb8] sm:$0xff]   ;;  %v596_v32 = vld [vmem:[#allocation2 + $0xc0] sm:$0xff]   ;;  %v597_v33 = vld [vmem:[#allocation2 + $0xc8] sm:$0xff]  }
  0x1a   :  { %519 = vmatprep.subr.bf16.mxu1 %v631_v0  ;;  %536 = vmatpush3.bf16.msra.mxu0 %v588_v14  ;;  %v598_v34 = vld [vmem:[#allocation2 + $0xd0] sm:$0xff]   ;;  %v599_v35 = vld [vmem:[#allocation2 + $0xd8] sm:$0xff]   ;;  %v600_v36 = vld [vmem:[#allocation2 + $0xe0] sm:$0xff]  }
  0x1b   :  { %537 = vmatprep.subr.bf16.mxu0 %v631_v0  ;;  %v601_v37 = vld [vmem:[#allocation2 + $0xe8] sm:$0xff]   ;;  %v451_v38 = vld [vmem:[%s724_s2 + $0x1] ss:$0 sm:$0xff]  ;;  %v602_v48 = vld [vmem:[#allocation2 + $0xf0] sm:$0xff]  }
  0x1c   :  { %v603_v49 = vld [vmem:[#allocation2 + $0xf8] sm:$0xff]   ;;  %v461_v50 = vld [vmem:[%s724_s2 + $0x2] ss:$0 sm:$0xff]  ;;  %v471_v60 = vld [vmem:[%s724_s2 + $0x3] ss:$0 sm:$0xff] }
  0x1d   :  { %520 = vmatpush3.bf16.msra.mxu1 %v582_v8 }
  0x1e   :  { %521 = vmatprep.subr.bf16.mxu1 %v631_v0  ;;  %538 = vmatpush3.bf16.msra.mxu0 %v589_v15 }
  0x1f   :  { %539 = vmatprep.subr.bf16.mxu0 %v631_v0 }
  0x21   :  { %522 = vmatpush3.bf16.msra.mxu1 %v583_v9 }
  0x22   :  { %523 = vmatprep.subr.bf16.mxu1 %v631_v0  ;;  %540 = vmatpush3.bf16.msra.mxu0 %v590_v16 }
  0x23   :  { %541 = vmatprep.subr.bf16.mxu0 %v631_v0 }
  0x25   :  { %524 = vmatpush3.bf16.msra.mxu1 %v584_v10 }
  0x26   :  { %525 = vmatprep.subr.bf16.mxu1 %v631_v0  ;;  %542 = vmatpush3.bf16.msra.mxu0 %v591_v17 }
  0x27   :  { %543 = vmatprep.subr.bf16.mxu0 %v631_v0 }
  0x29   :  { %526 = vmatpush3.bf16.msra.mxu1 %v585_v11 }
  0x2a   :  { %527 = vmatprep.subr.bf16.mxu1 %v631_v0  ;;  %544 = vmatpush3.bf16.msra.mxu0 %v592_v18 }
  0x2b   :  { %545 = vmatprep.subr.bf16.mxu0 %v631_v0 }
  0x2d   :  { %528 = vmatpush3.bf16.msra.mxu1 %v586_v12 }
  0x2e   :  { %529 = vmatprep.subr.bf16.mxu1 %v631_v0  ;;  %546 = vmatpush3.bf16.msra.mxu0 %v593_v19 }
  0x2f   :  { %547 = vmatprep.subr.bf16.mxu0 %v631_v0 }
  0x31   :  { %530 = vmatpush3.bf16.msra.mxu1 %v587_v13 }
  0x32   :  { %555 = vmatprep.subr.bf16.mxu1 %v631_v0  ;;  %548 = vmatpush3.bf16.msra.mxu0 %v594_v30 }
  0x33   :  { %549 = vmatprep.subr.bf16.mxu0 %v631_v0 }
  0x36   :  { %550 = vmatpush3.bf16.msra.mxu0 %v595_v31 }
  0xeb   :  { %v82_v21 = vpop.f32.mrb[0].mxu0 }
  0xec   :  { %v83_v22 = vadd.f32 %v448_v20, %v82_v21  ;;  %v513_v23 = vpop.f32.mrb[1].mxu0 }
  0xed   :  { %v85_v24 = vpop.f32.mrb[2].mxu0 }
  0xee   :  { %v86_v25 = vadd.f32 %v448_v20, %v85_v24  ;;  %v514_v26 = vpop.f32.mrb[3].mxu0  ;;  %v89_v27 = vmax.f32 %v83_v22, 0.0 }
  0xf0   :  { %v90_v28 = vmax.f32 %v86_v25, 0.0 }
  0xf2   :  { %v91_v29 = vpack.c.bf16 %v90_v28, %v89_v27 }
  0xf4   :  { %532 = vmatmul.mubr.bf16.vlgmr.msra.gmra.mrb[0].mxu1 %v91_v29 }
  0xf5   :  { %571 = vmatprep.mubr.msk.bf16.mxu1 %vm632_vm0, %v631_v0  ;;  %556 = vmatpush3.bf16.msra.mxu1 %v596_v32 }
  0xf6   :  { %557 = vmatprep.subr.bf16.mxu1 %v631_v0 }
  0xf9   :  { %558 = vmatpush3.bf16.msra.mxu1 %v597_v33 }
  0xfa   :  { %559 = vmatprep.subr.bf16.mxu1 %v631_v0 }
  0xfd   :  { %560 = vmatpush3.bf16.msra.mxu1 %v598_v34 }
  0xfe   :  { %561 = vmatprep.subr.bf16.mxu1 %v631_v0 }
 0x101   :  { %562 = vmatpush3.bf16.msra.mxu1 %v599_v35 }
 0x102   :  { %563 = vmatprep.subr.bf16.mxu1 %v631_v0 }
 0x105   :  { %564 = vmatpush3.bf16.msra.mxu1 %v600_v36 }
 0x106   :  { %565 = vmatprep.subr.bf16.mxu1 %v631_v0 }
 0x109   :  { %566 = vmatpush3.bf16.msra.mxu1 %v601_v37 }
 0x10a   :  { %567 = vmatprep.subr.bf16.mxu1 %v631_v0 }
 0x10d   :  { %568 = vmatpush3.bf16.msra.mxu1 %v602_v48 }
 0x10e   :  { %569 = vmatprep.subr.bf16.mxu1 %v631_v0 }
 0x111   :  { %570 = vmatpush3.bf16.msra.mxu1 %v603_v49 }
 0x1c7   :  { %v199_v39 = vpop.f32.mrb[0].mxu1 }
 0x1c8   :  { %v200_v40 = vadd.f32 %v451_v38, %v199_v39  ;;  %v533_v41 = vpop.f32.mrb[1].mxu1 }
 0x1c9   :  { %v202_v42 = vpop.f32.mrb[2].mxu1 }
 0x1ca   :  { %v203_v43 = vadd.f32 %v451_v38, %v202_v42  ;;  %v534_v44 = vpop.f32.mrb[3].mxu1  ;;  %v206_v45 = vmax.f32 %v200_v40, 0.0 }
 0x1cc   :  { %v207_v46 = vmax.f32 %v203_v43, 0.0 }
 0x1ce   :  { %v208_v47 = vpack.c.bf16 %v207_v46, %v206_v45 }
 0x1d0   :  { %552 = vmatmul.mubr.bf16.vlgmr.msra.gmra.mrb[4].mxu0 %v208_v47 }
 0x2a3   :  { %v316_v51 = vpop.f32.mrb[4].mxu0 }
 0x2a4   :  { %v317_v52 = vadd.f32 %v461_v50, %v316_v51  ;;  %v553_v53 = vpop.f32.mrb[5].mxu0 }
 0x2a5   :  { %v319_v54 = vpop.f32.mrb[6].mxu0 }
 0x2a6   :  { %v320_v55 = vadd.f32 %v461_v50, %v319_v54  ;;  %v554_v56 = vpop.f32.mrb[7].mxu0  ;;  %v323_v57 = vmax.f32 %v317_v52, 0.0 }
 0x2a8   :  { %v324_v58 = vmax.f32 %v320_v55, 0.0 }
 0x2aa   :  { %v325_v59 = vpack.c.bf16 %v324_v58, %v323_v57 }
 0x2ac   :  { %572 = vmatmul.mubr.bf16.vlgmr.msra.gmra.mrb[4].mxu1 %v325_v59 }
 0x37f   :  { %v433_v61 = vpop.f32.mrb[4].mxu1 }
 0x380   :  { %v434_v62 = vadd.f32 %v471_v60, %v433_v61  ;;  %v573_v63 = vpop.f32.mrb[5].mxu1 }
 0x381   :  { %v436_v0 = vpop.f32.mrb[6].mxu1 }
 0x382   :  { %441 = vst.msk [vmem:[%s725_s3] sm:$0xff] %vm440_vm3, %v434_v62  ;;  %v437_v1 = vadd.f32 %v471_v60, %v436_v0  ;;  %v574_v2 = vpop.f32.mrb[7].mxu1 }
 0x384   :  { %442 = vst.msk [vmem:[%s725_s3 + $0x8] sm:$0xff] %vm440_vm3, %v437_v1 }
 0x385   :  { %447 = vsyncpa [#allocation3], 1 }

</bundles_post_ra>
